<compile_context>
chip_gen: v6e
topology: v6e:2x2x1
jax: 0.10.0
libtpu: 0.0.40
codegen_flags: <defaults>
</compile_context>

<pallas_src>
import jax
import jax.numpy as jnp
from jax.experimental import pallas as pl
from jax.experimental.pallas import tpu as pltpu

LANES = 128                  # lane width
SAMPLES_PER_ROW = LANES      # 128 samples (256 interleaved values) per slab row
MAX_TILE_ROWS = 1024         # 1 MiB f32 block per side at (1024, 256)


def _round_up(v, m):
    return ((v + m - 1) // m) * m


def xor_kernel(params_ref, x_ref, o_ref):
    """params_ref: SMEM f32[22]  (w1[4,2] | b1[4] | w2[2,4] | b2[2], torch layout)
    x_ref:  VMEM (tile_r, 256) io_dtype -- 128 samples/row, lane-interleaved
            as [x0, x1, x0, x1, ...]
    o_ref:  VMEM (tile_r, 256) io_dtype -- same interleaved layout [y0, y1, ...]
    """
    x = x_ref[...].astype(jnp.float32)
    rows, cols = x.shape

    lane = jax.lax.broadcasted_iota(jnp.int32, (rows, cols), 1)
    even = (lane & 1) == 0

    # Neighbour lanes via XLU rotates (np.roll semantics: out[c] = in[c - shift]).
    # Wrapped values (col 0 / col cols-1) are never selected by the parity masks.
    x_prev = pltpu.roll(x, 1, axis=1)          # out[c] = x[c - 1]
    x_next = pltpu.roll(x, cols - 1, axis=1)   # out[c] = x[c + 1]

    # Broadcast each sample's (x0, x1) onto both of its lanes.
    x0 = jnp.where(even, x, x_prev)
    x1 = jnp.where(even, x_next, x)

    # fc1 + relu fused with the fc2 accumulation (pure VPU FMAs, params in SMEM).
    # Even lanes produce y0 (w2 row 0 / b2[0]); odd lanes produce y1.
    y = jnp.where(even, params_ref[20], params_ref[21])                 # b2
    for j in range(4):
        hj = jnp.maximum(
            params_ref[2 * j] * x0 + params_ref[2 * j + 1] * x1 + params_ref[8 + j],
            0.0,
        )
        w2j = jnp.where(even, params_ref[12 + j], params_ref[16 + j])
        y = y + w2j * hj
    o_ref[...] = jnp.maximum(y, 0.0).astype(o_ref.dtype)


def xor_forward(x, w1, b1, w2, b2, *, io_dtype=jnp.float32):
    """x: any shape with total elements divisible by 2 (mirrors x.view(-1, 2)).
    w1: (4, 2), b1: (4,), w2: (2, 4), b2: (2,)  -- exact nn.Linear layouts.
    Returns: (N, 2) with N = x.size // 2 (dtype = io_dtype).
    """
    x2 = x.reshape(-1, 2).astype(jnp.float32)
    n = x2.shape[0]

    # Slab geometry: 128 samples (256 interleaved scalars) per row.
    r = max(1, pl.cdiv(n, SAMPLES_PER_ROW))
    if r <= 16:
        steps = 1
    else:
        # >= 2 grid steps so the "parallel" axis uses both v7x TensorCores.
        steps = max(2, pl.cdiv(r, MAX_TILE_ROWS))
    tile_r = _round_up(pl.cdiv(r, steps), 16)   # multiple of 16: f32 & bf16 tiling
    r_pad = tile_r * steps
    n_pad = r_pad * SAMPLES_PER_ROW

    # Natural interleaved layout: only a pad (single fused pass, skipped when
    # unnecessary) and free reshapes -- no transpose passes in the wrapper.
    flat = x2.reshape(-1)
    if n_pad != n:
        flat = jnp.pad(flat, (0, 2 * (n_pad - n)))
    x_slab = flat.reshape(r_pad, 2 * LANES).astype(io_dtype)

    # Pack the 22 parameter scalars for SMEM residency.
    params = jnp.concatenate(
        [w1.reshape(-1), b1.reshape(-1), w2.reshape(-1), b2.reshape(-1)]
    ).astype(jnp.float32)

    itemsize = jnp.dtype(io_dtype).itemsize
    out_slab = pl.pallas_call(
        xor_kernel,
        out_shape=jax.ShapeDtypeStruct((r_pad, 2 * LANES), io_dtype),
        grid=(steps,),
        in_specs=[
            pl.BlockSpec(memory_space=pltpu.MemorySpace.SMEM),       # 22 params
            pl.BlockSpec((tile_r, 2 * LANES), lambda i: (i, 0)),     # x slab
        ],
        out_specs=pl.BlockSpec((tile_r, 2 * LANES), lambda i: (i, 0)),
        compiler_params=pltpu.CompilerParams(
            dimension_semantics=("parallel",),
            vmem_limit_bytes=32 * 1024 * 1024,   # headroom on v5e's 16 MiB default
        ),
        cost_estimate=pl.CostEstimate(
            flops=64 * n_pad,
            transcendentals=0,
            bytes_accessed=2 * r_pad * 2 * LANES * itemsize + params.size * 4,
        ),
    )(params, x_slab)

    # Free reshape back to (N, 2); padded tail rows (garbage = relu-of-bias)
    # are sliced off.  No transpose pass on the output either.
    out = out_slab.reshape(n_pad, 2)
    return out if n_pad == n else out[:n]


def init_params(key):
    # Deterministic synthetic init matching nn.Linear shapes:
    #   fc1: weight (4, 2), bias (4,)   fc2: weight (2, 4), bias (2,)
    k1, k2, k3, k4 = jax.random.split(key, 4)
    w1 = jax.random.normal(k1, (4, 2), jnp.float32) * 0.5
    b1 = jax.random.normal(k2, (4,), jnp.float32) * 0.1
    w2 = jax.random.normal(k3, (2, 4), jnp.float32) * 0.5
    b2 = jax.random.normal(k4, (2,), jnp.float32) * 0.1
    return w1, b1, w2, b2


if __name__ == "__main__":
    key = jax.random.PRNGKey(0)
    kx1, kx2, kp = jax.random.split(key, 3)

    w1, b1, w2, b2 = init_params(kp)

    def reference(xin):
        x2 = xin.reshape(-1, 2)
        h = jnp.maximum(x2 @ w1.T + b1, 0.0)
        return jnp.maximum(h @ w2.T + b2, 0.0)

    # Small XOR-style batch of R^2 points.
    x_small = jax.random.uniform(kx1, (8, 2), jnp.float32)
    out_small = jax.block_until_ready(xor_forward(x_small, w1, b1, w2, b2))
    assert out_small.shape == (8, 2)
    assert jnp.allclose(out_small, reference(x_small), atol=1e-5, rtol=1e-5), \
        "mismatch vs reference (small batch)"

    # Larger batch exercising padding and a 2-step grid.
    x_big = jax.random.uniform(kx2, (3000, 2), jnp.float32)
    out_big = jax.block_until_ready(xor_forward(x_big, w1, b1, w2, b2))
    assert out_big.shape == (3000, 2)
    assert jnp.allclose(out_big, reference(x_big), atol=1e-5, rtol=1e-5), \
        "mismatch vs reference (large batch)"

    print("KERNEL_OK")
</pallas_src>

<mosaic_0001>
module attributes {stable_mosaic.version = 11 : i64} {
  func.func @xor_kernel(%arg0: i32, %arg1: memref<22xf32, #tpu.memory_space<smem>>, %arg2: memref<16x256xf32, #tpu.memory_space<vmem>>, %arg3: memref<16x256xf32, #tpu.memory_space<vmem>>) attributes {dimension_semantics = [#tpu.dimension_semantics<parallel>], iteration_bounds = array<i64: 1>, scalar_prefetch = 0 : i64, scratch_operands = 0 : i64, tpu.core_type = #tpu.core_type<tc>, window_params = [{transform_indices = @transform_0, window_bounds = array<i64: 22>}, {transform_indices = @transform_1, window_bounds = array<i64: 16, 256>}, {transform_indices = @transform_2, window_bounds = array<i64: 16, 256>}]} {
    %c0 = arith.constant 0 : index
    %c0_0 = arith.constant 0 : index
    %0 = vector.load %arg2[%c0, %c0_0] : memref<16x256xf32, #tpu.memory_space<vmem>>, vector<16x256xf32>
    %1 = tpu.iota {dimensions = array<i32: 1>} : vector<16x256xi32>
    %c1_i32 = arith.constant 1 : i32
    %2 = vector.broadcast %c1_i32 : i32 to vector<16x256xi32>
    %3 = arith.andi %1, %2 : vector<16x256xi32>
    %c0_i32 = arith.constant 0 : i32
    %4 = vector.broadcast %c0_i32 : i32 to vector<16x256xi32>
    %5 = arith.cmpi eq, %3, %4 : vector<16x256xi32>
    %c1_i32_1 = arith.constant 1 : i32
    %6 = tpu.dynamic_rotate %0 by %c1_i32_1 dim 1 : vector<16x256xf32>, i32 -> vector<16x256xf32>
    %c255_i32 = arith.constant 255 : i32
    %7 = tpu.dynamic_rotate %0 by %c255_i32 dim 1 : vector<16x256xf32>, i32 -> vector<16x256xf32>
    %8 = arith.select %5, %0, %6 : vector<16x256xi1>, vector<16x256xf32>
    %9 = arith.select %5, %7, %0 : vector<16x256xi1>, vector<16x256xf32>
    %c20 = arith.constant 20 : index
    %10 = memref.load %arg1[%c20] : memref<22xf32, #tpu.memory_space<smem>>
    %c21 = arith.constant 21 : index
    %11 = memref.load %arg1[%c21] : memref<22xf32, #tpu.memory_space<smem>>
    %12 = vector.broadcast %10 : f32 to vector<16x256xf32>
    %13 = vector.broadcast %11 : f32 to vector<16x256xf32>
    %14 = arith.select %5, %12, %13 : vector<16x256xi1>, vector<16x256xf32>
    %c0_2 = arith.constant 0 : index
    %15 = memref.load %arg1[%c0_2] : memref<22xf32, #tpu.memory_space<smem>>
    %16 = vector.broadcast %15 : f32 to vector<16x256xf32>
    %17 = arith.mulf %16, %8 : vector<16x256xf32>
    %c1 = arith.constant 1 : index
    %18 = memref.load %arg1[%c1] : memref<22xf32, #tpu.memory_space<smem>>
    %19 = vector.broadcast %18 : f32 to vector<16x256xf32>
    %20 = arith.mulf %19, %9 : vector<16x256xf32>
    %21 = arith.addf %17, %20 : vector<16x256xf32>
    %c8 = arith.constant 8 : index
    %22 = memref.load %arg1[%c8] : memref<22xf32, #tpu.memory_space<smem>>
    %23 = vector.broadcast %22 : f32 to vector<16x256xf32>
    %24 = arith.addf %21, %23 : vector<16x256xf32>
    %cst = arith.constant 0.000000e+00 : f32
    %25 = vector.broadcast %cst : f32 to vector<16x256xf32>
    %26 = arith.maximumf %24, %25 : vector<16x256xf32>
    %c12 = arith.constant 12 : index
    %27 = memref.load %arg1[%c12] : memref<22xf32, #tpu.memory_space<smem>>
    %c16 = arith.constant 16 : index
    %28 = memref.load %arg1[%c16] : memref<22xf32, #tpu.memory_space<smem>>
    %29 = vector.broadcast %27 : f32 to vector<16x256xf32>
    %30 = vector.broadcast %28 : f32 to vector<16x256xf32>
    %31 = arith.select %5, %29, %30 : vector<16x256xi1>, vector<16x256xf32>
    %32 = arith.mulf %31, %26 : vector<16x256xf32>
    %33 = arith.addf %14, %32 : vector<16x256xf32>
    %c2 = arith.constant 2 : index
    %34 = memref.load %arg1[%c2] : memref<22xf32, #tpu.memory_space<smem>>
    %35 = vector.broadcast %34 : f32 to vector<16x256xf32>
    %36 = arith.mulf %35, %8 : vector<16x256xf32>
    %c3 = arith.constant 3 : index
    %37 = memref.load %arg1[%c3] : memref<22xf32, #tpu.memory_space<smem>>
    %38 = vector.broadcast %37 : f32 to vector<16x256xf32>
    %39 = arith.mulf %38, %9 : vector<16x256xf32>
    %40 = arith.addf %36, %39 : vector<16x256xf32>
    %c9 = arith.constant 9 : index
    %41 = memref.load %arg1[%c9] : memref<22xf32, #tpu.memory_space<smem>>
    %42 = vector.broadcast %41 : f32 to vector<16x256xf32>
    %43 = arith.addf %40, %42 : vector<16x256xf32>
    %cst_3 = arith.constant 0.000000e+00 : f32
    %44 = vector.broadcast %cst_3 : f32 to vector<16x256xf32>
    %45 = arith.maximumf %43, %44 : vector<16x256xf32>
    %c13 = arith.constant 13 : index
    %46 = memref.load %arg1[%c13] : memref<22xf32, #tpu.memory_space<smem>>
    %c17 = arith.constant 17 : index
    %47 = memref.load %arg1[%c17] : memref<22xf32, #tpu.memory_space<smem>>
    %48 = vector.broadcast %46 : f32 to vector<16x256xf32>
    %49 = vector.broadcast %47 : f32 to vector<16x256xf32>
    %50 = arith.select %5, %48, %49 : vector<16x256xi1>, vector<16x256xf32>
    %51 = arith.mulf %50, %45 : vector<16x256xf32>
    %52 = arith.addf %33, %51 : vector<16x256xf32>
    %c4 = arith.constant 4 : index
    %53 = memref.load %arg1[%c4] : memref<22xf32, #tpu.memory_space<smem>>
    %54 = vector.broadcast %53 : f32 to vector<16x256xf32>
    %55 = arith.mulf %54, %8 : vector<16x256xf32>
    %c5 = arith.constant 5 : index
    %56 = memref.load %arg1[%c5] : memref<22xf32, #tpu.memory_space<smem>>
    %57 = vector.broadcast %56 : f32 to vector<16x256xf32>
    %58 = arith.mulf %57, %9 : vector<16x256xf32>
    %59 = arith.addf %55, %58 : vector<16x256xf32>
    %c10 = arith.constant 10 : index
    %60 = memref.load %arg1[%c10] : memref<22xf32, #tpu.memory_space<smem>>
    %61 = vector.broadcast %60 : f32 to vector<16x256xf32>
    %62 = arith.addf %59, %61 : vector<16x256xf32>
    %cst_4 = arith.constant 0.000000e+00 : f32
    %63 = vector.broadcast %cst_4 : f32 to vector<16x256xf32>
    %64 = arith.maximumf %62, %63 : vector<16x256xf32>
    %c14 = arith.constant 14 : index
    %65 = memref.load %arg1[%c14] : memref<22xf32, #tpu.memory_space<smem>>
    %c18 = arith.constant 18 : index
    %66 = memref.load %arg1[%c18] : memref<22xf32, #tpu.memory_space<smem>>
    %67 = vector.broadcast %65 : f32 to vector<16x256xf32>
    %68 = vector.broadcast %66 : f32 to vector<16x256xf32>
    %69 = arith.select %5, %67, %68 : vector<16x256xi1>, vector<16x256xf32>
    %70 = arith.mulf %69, %64 : vector<16x256xf32>
    %71 = arith.addf %52, %70 : vector<16x256xf32>
    %c6 = arith.constant 6 : index
    %72 = memref.load %arg1[%c6] : memref<22xf32, #tpu.memory_space<smem>>
    %73 = vector.broadcast %72 : f32 to vector<16x256xf32>
    %74 = arith.mulf %73, %8 : vector<16x256xf32>
    %c7 = arith.constant 7 : index
    %75 = memref.load %arg1[%c7] : memref<22xf32, #tpu.memory_space<smem>>
    %76 = vector.broadcast %75 : f32 to vector<16x256xf32>
    %77 = arith.mulf %76, %9 : vector<16x256xf32>
    %78 = arith.addf %74, %77 : vector<16x256xf32>
    %c11 = arith.constant 11 : index
    %79 = memref.load %arg1[%c11] : memref<22xf32, #tpu.memory_space<smem>>
    %80 = vector.broadcast %79 : f32 to vector<16x256xf32>
    %81 = arith.addf %78, %80 : vector<16x256xf32>
    %cst_5 = arith.constant 0.000000e+00 : f32
    %82 = vector.broadcast %cst_5 : f32 to vector<16x256xf32>
    %83 = arith.maximumf %81, %82 : vector<16x256xf32>
    %c15 = arith.constant 15 : index
    %84 = memref.load %arg1[%c15] : memref<22xf32, #tpu.memory_space<smem>>
    %c19 = arith.constant 19 : index
    %85 = memref.load %arg1[%c19] : memref<22xf32, #tpu.memory_space<smem>>
    %86 = vector.broadcast %84 : f32 to vector<16x256xf32>
    %87 = vector.broadcast %85 : f32 to vector<16x256xf32>
    %88 = arith.select %5, %86, %87 : vector<16x256xi1>, vector<16x256xf32>
    %89 = arith.mulf %88, %83 : vector<16x256xf32>
    %90 = arith.addf %71, %89 : vector<16x256xf32>
    %cst_6 = arith.constant 0.000000e+00 : f32
    %91 = vector.broadcast %cst_6 : f32 to vector<16x256xf32>
    %92 = arith.maximumf %90, %91 : vector<16x256xf32>
    %c0_7 = arith.constant 0 : index
    %c0_8 = arith.constant 0 : index
    %93 = vector.load %arg3[%c0_7, %c0_8] : memref<16x256xf32, #tpu.memory_space<vmem>>, vector<16x256xf32>
    tpu.vector_store %arg3[%c0_7, %c0_8], %92 {strides = array<i32>} : memref<16x256xf32, #tpu.memory_space<vmem>>, vector<16x256xf32>,
    return
  }
  func.func @transform_0(%arg0: i32) -> i32 {
    %c0_i32 = arith.constant 0 : i32
    %c0_i32_0 = arith.constant 0 : i32
    return %c0_i32 : i32
  }
  func.func @transform_1(%arg0: i32) -> (i32, i32) {
    %c0_i32 = arith.constant 0 : i32
    %c0_i32_0 = arith.constant 0 : i32
    return %arg0, %c0_i32 : i32, i32
  }
  func.func @transform_2(%arg0: i32) -> (i32, i32) {
    %c0_i32 = arith.constant 0 : i32
    %c0_i32_0 = arith.constant 0 : i32
    return %arg0, %c0_i32 : i32, i32
  }
}

</mosaic_0001>

<bundles_post_ra>
// kernel: tpu_custom_call.1
= control target key start
LH: loop header
LB: loop body
LE: loop exit
PB: predicated region body
PF: predicated region fallthrough
CT: control target
= control target key end

     0   :  { %7 = vsyncpa [#allocation5], 0  ;;  %s661_s0 = inlined_call_operand.hbm [shape: f32[22], index: 0, kind: input, shape index: {}]   ;;  %s662_s1 = inlined_call_operand.hbm [shape: f32[16,256], index: 1, kind: input, shape index: {}]   ;;  %s663_s2 = inlined_call_operand.hbm [shape: f32[16,256], index: 2, kind: output, shape index: {}]  }
   0x1   :  { %8 = vsyncpa [#allocation3], 0 }
   0x2   :  { %9 = vsyncpa [#allocation4], 0  ;;  %s356_s9 = smov [#allocation2]   ;;  %s357_s12 = smov [#allocation6]  }
   0x3   :  { %17 = dma.hbm_to_smem %s661_s0, 16, %s356_s9, [#allocation5]  }
   0x4   :  { %s23_s13 = sshll.u32 %s357_s12, 4  ;;  %s24_s13 = int_to_ptr.vmem [resolvable:$true] %s23_s13 }
   0x5   :  { %s318_s14 = scalar_lea.vmem %s24_s13, 512  ;;  %p323_p1 = scmp.lt.s32.totalorder %s24_s13, %s24_s13 }
   0x6   :  { %p319_p0 = scmp.ne.s32.totalorder %s24_s13, %s318_s14  ;;  %p324_p2 = scmp.lt.s32.totalorder %s318_s14, %s318_s14 }
   0x8   :  { %p325_p3 = por %p324_p2, %p323_p1 }
   0xa   :  { %p326_p4 = pnand %p325_p3, %p319_p0 }
   0xc   :  { %329 = shalt.err (!%p326_p4)
}
   0xd   :  { %s358_s15 = smov 256   ;;  %s359_s16 = smov 16  }
   0xe   :  { %29 = dma.hbm_to_vmem [thread:$0]  %s662_s1, 512, %s24_s13, [#allocation3], %s358_s15, %s358_s15, %s359_s16  }
   0xf   :  { %350 = dma.done.wait [#allocation5], 16  }
  0x10   :  { %351 = vsyncadd [#allocation5], 4294967280 }
  0x11   :  { %352 = dma.done.wait [#allocation3], 512  }
  0x12   :  { %353 = vsyncadd [#allocation3], 4294966784 }
  0x13   :  { %36 = sfence }
  0x14   :  { %v387_v0 = vld [vmem:[#allocation6 + $0x8] sm:$0xff]  ;;  %v389_v1 = vld [vmem:[#allocation6] sm:$0xff]  ;;  %s360_s0 = smov 1   ;;  %v393_v2 = vld [vmem:[#allocation6 + $0x18] sm:$0xff]  ;;  %s361_s1 = smov 127   ;;  %v41_v4 = vlaneseq }
  0x15   :  { %52 = vrot.lane.b32.xlu1 %v387_v0, %s360_s0  ;;  %48 = vrot.lane.b32.xlu0 %v389_v1, %s360_s0  ;;  %v395_v3 = vld [vmem:[#allocation6 + $0x10] sm:$0xff]  ;;  %s403_s19 = sld [smem:[#allocation2]]  ;;  %s362_s13 = smov [#allocation7]  }
  0x16   :  { %s405_s20 = sld [smem:[#allocation2 + $0x2]]  ;;  %v423_v5 = vand.u32 127, %v41_v4  ;;  %s261_s14 = sshll.u32 %s362_s13, 4  ;;  %s262_s14 = int_to_ptr.vmem [resolvable:$true] %s261_s14 }
  0x17   :  { %s407_s21 = sld [smem:[#allocation2 + $0x4]]  ;;  %s330_s17 = scalar_lea.vmem %s262_s14, 512 }
  0x18   :  { %s409_s22 = sld [smem:[#allocation2 + $0x6]]  ;;  %v43_v6 = vadd.s32 128, %v423_v5  ;;  %v44_v7 = vand.u32 1, %v423_v5  ;;  %vm56_vm0 = vcmp.lt.s32.totalorder %v423_v5, 1  ;;  %vm69_vm3 = vcmp.lt.s32.totalorder %v423_v5, 127  ;;  %p331_p5 = scmp.ne.s32.totalorder %s262_s14, %s330_s17 }
  0x19   :  { %54 = vrot.lane.b32.xlu1 %v393_v2, %s360_s0  ;;  %50 = vrot.lane.b32.xlu0 %v395_v3, %s360_s0  ;;  %s411_s23 = sld [smem:[#allocation2 + $0x1]]  ;;  %p335_p6 = scmp.lt.s32.totalorder %s262_s14, %s262_s14 }
  0x1a   :  { %s413_s24 = sld [smem:[#allocation2 + $0x8]]  ;;  %v45_v8 = vand.u32 1, %v43_v6  ;;  %vm452_vm1 = vcmp.eq.s32.totalorder %v44_v7, 0  ;;  %p336_p7 = scmp.lt.s32.totalorder %s330_s17, %s330_s17 }
  0x1b   :  { %s415_s25 = sld [smem:[#allocation2 + $0xc]]  ;;  %v89_v13 = vstv %s403_s19 }
  0x1c   :  { %s417_s26 = sld [smem:[#allocation2 + $0x10]]  ;;  %vm456_vm2 = vcmp.eq.s32.totalorder %v45_v8, 0  ;;  %v129_v14 = vstv %s405_s20  ;;  %p337_p8 = por %p336_p7, %p335_p6 }
  0x1d   :  { %63 = vrot.lane.b32.xlu1 %v395_v3, %s361_s1  ;;  %61 = vrot.lane.b32.xlu0 %v389_v1, %s361_s1  ;;  %s419_s27 = sld [smem:[#allocation2 + $0x3]]  ;;  %v169_v16 = vstv %s407_s21 }
  0x1e   :  { %s421_s28 = sld [smem:[#allocation2 + $0x9]]  ;;  %v209_v17 = vstv %s409_s22  ;;  %p338_p9 = pnand %p337_p8, %p331_p5 }
  0x1f   :  { %s425_s29 = sld [smem:[#allocation2 + $0x5]]  ;;  %v467_v19 = vstv %s411_s23 }
  0x20   :  { %s427_s30 = sld [smem:[#allocation2 + $0xa]]  ;;  %v470_v20 = vstv %s413_s24 }
  0x21   :  { %67 = vrot.lane.b32.xlu1 %v393_v2, %s361_s1  ;;  %65 = vrot.lane.b32.xlu0 %v387_v0, %s361_s1  ;;  %s429_s3 = sld [smem:[#allocation2 + $0x7]]  ;;  %v116_v9 = vstv %s415_s25 }
  0x22   :  { %s431_s4 = sld [smem:[#allocation2 + $0x14]]  ;;  %v117_v10 = vstv %s417_s26 }
  0x23   :  { %s434_s5 = sld [smem:[#allocation2 + $0x15]]  ;;  %v474_v21 = vsel %vm452_vm1, %v116_v9, %v117_v10  ;;  %v478_v22 = vsel %vm456_vm2, %v116_v9, %v117_v10  ;;  %v484_v25 = vstv %s419_s27 }
  0x24   :  { %s436_s6 = sld [smem:[#allocation2 + $0xd]]  ;;  %v487_v26 = vstv %s421_s28 }
  0x25   :  { %s438_s7 = sld [smem:[#allocation2 + $0x11]]  ;;  %v490_v27 = vstv %s425_s29 }
  0x26   :  { %s440_s8 = sld [smem:[#allocation2 + $0xe]]  ;;  %v493_v28 = vstv %s427_s30 }
  0x27   :  { %s443_s9 = sld [smem:[#allocation2 + $0x12]]  ;;  %v502_v35 = vstv %s429_s3 }
  0x28   :  { %s445_s10 = sld [smem:[#allocation2 + $0xf]]  ;;  %v84_v23 = vstv %s431_s4 }
  0x29   :  { %s447_s11 = sld [smem:[#allocation2 + $0x13]]  ;;  %v85_v24 = vstv %s434_s5 }
  0x2a   :  { %s462_s12 = sld [smem:[#allocation2 + $0xb]]  ;;  %v156_v31 = vstv %s436_s6  ;;  %v506_v36 = vsel %vm452_vm1, %v84_v23, %v85_v24  ;;  %v524_v45 = vsel %vm456_vm2, %v84_v23, %v85_v24 }
  0x2b   :  { %v157_v32 = vstv %s438_s7 }
  0x2c   :  { %v196_v37 = vstv %s440_s8  ;;  %v528_v46 = vsel %vm452_vm1, %v156_v31, %v157_v32  ;;  %v532_v47 = vsel %vm456_vm2, %v156_v31, %v157_v32 }
  0x2d   :  { %v197_v38 = vstv %s443_s9 }
  0x2e   :  { %v236_v41 = vstv %s445_s10  ;;  %v536_v48 = vsel %vm452_vm1, %v196_v37, %v197_v38  ;;  %v540_v49 = vsel %vm456_vm2, %v196_v37, %v197_v38 }
  0x2f   :  { %v237_v42 = vstv %s447_s11 }
  0x30   :  { %v543_v50 = vstv %s462_s12  ;;  %v553_v55 = vsel %vm452_vm1, %v236_v41, %v237_v42  ;;  %v557_v56 = vsel %vm456_vm2, %v236_v41, %v237_v42 }
  0x87   :  { %v53_v15 = vpop.permute.xlu1 %52  ;;  %v49_v18 = vpop.permute.xlu0 %48 }
  0x88   :  { %v57_v29 = vsel %vm56_vm0, %v49_v18, %v53_v15  ;;  %v59_v30 = vsel %vm56_vm0, %v53_v15, %v49_v18 }
  0x89   :  { %v74_v43 = vsel %vm452_vm1, %v389_v1, %v59_v30  ;;  %v75_v44 = vsel %vm456_vm2, %v387_v0, %v57_v29 }
  0x8a   :  { %v90_v57 = vmul.f32 %v89_v13, %v74_v43  ;;  %v91_v58 = vmul.f32 %v89_v13, %v75_v44  ;;  %v559_v59 = vmul.f32 %v129_v14, %v74_v43  ;;  %v561_v60 = vmul.f32 %v129_v14, %v75_v44 }
  0x8b   :  { %v55_v33 = vpop.permute.xlu1 %54  ;;  %v51_v34 = vpop.permute.xlu0 %50  ;;  %v563_v61 = vmul.f32 %v169_v16, %v74_v43  ;;  %v565_v62 = vmul.f32 %v169_v16, %v75_v44  ;;  %v567_v63 = vmul.f32 %v209_v17, %v74_v43  ;;  %v569_v4 = vmul.f32 %v209_v17, %v75_v44 }
  0x8c   :  { %v58_v39 = vsel %vm56_vm0, %v51_v34, %v55_v33  ;;  %v60_v40 = vsel %vm56_vm0, %v55_v33, %v51_v34 }
  0x8d   :  { %v76_v51 = vsel %vm452_vm1, %v395_v3, %v60_v40  ;;  %v77_v52 = vsel %vm456_vm2, %v393_v2, %v58_v39 }
  0x8e   :  { %v92_v6 = vmul.f32 %v89_v13, %v76_v51  ;;  %v93_v7 = vmul.f32 %v89_v13, %v77_v52  ;;  %v132_v8 = vmul.f32 %v129_v14, %v76_v51  ;;  %v133_v9 = vmul.f32 %v129_v14, %v77_v52 }
  0x8f   :  { %v64_v53 = vpop.permute.xlu1 %63  ;;  %v62_v54 = vpop.permute.xlu0 %61  ;;  %v172_v10 = vmul.f32 %v169_v16, %v76_v51  ;;  %v173_v15 = vmul.f32 %v169_v16, %v77_v52  ;;  %v212_v18 = vmul.f32 %v209_v17, %v76_v51  ;;  %v213_v23 = vmul.f32 %v209_v17, %v77_v52 }
  0x93   :  { %v68_v24 = vpop.permute.xlu1 %67  ;;  %v66_v29 = vpop.permute.xlu0 %65 }
  0x94   :  { %v71_v30 = vsel %vm69_vm3, %v64_v53, %v68_v24  ;;  %v73_v31 = vsel %vm69_vm3, %v68_v24, %v64_v53  ;;  %v70_v32 = vsel %vm69_vm3, %v62_v54, %v66_v29  ;;  %v72_v13 = vsel %vm69_vm3, %v66_v29, %v62_v54 }
  0x95   :  { %v80_v14 = vsel %vm452_vm1, %v71_v30, %v395_v3  ;;  %v81_v16 = vsel %vm456_vm2, %v73_v31, %v393_v2  ;;  %v78_v17 = vsel %vm452_vm1, %v70_v32, %v389_v1  ;;  %v79_v33 = vsel %vm456_vm2, %v72_v13, %v387_v0 }
  0x96   :  { %v98_v34 = vmul.f32 %v467_v19, %v80_v14  ;;  %v99_v5 = vmul.f32 %v467_v19, %v81_v16  ;;  %v138_v37 = vmul.f32 %v484_v25, %v80_v14  ;;  %v139_v3 = vmul.f32 %v484_v25, %v81_v16 }
  0x97   :  { %v178_v38 = vmul.f32 %v490_v27, %v80_v14  ;;  %v179_v2 = vmul.f32 %v490_v27, %v81_v16  ;;  %v218_v39 = vmul.f32 %v502_v35, %v80_v14  ;;  %v219_v1 = vmul.f32 %v502_v35, %v81_v16 }
  0x98   :  { %v102_v11 = vadd.f32 %v98_v34, %v92_v6  ;;  %v103_v40 = vadd.f32 %v99_v5, %v93_v7  ;;  %v142_v12 = vadd.f32 %v138_v37, %v132_v8  ;;  %v143_v0 = vadd.f32 %v139_v3, %v133_v9 }
  0x99   :  { %v182_v41 = vadd.f32 %v178_v38, %v172_v10  ;;  %v183_v42 = vadd.f32 %v179_v2, %v173_v15  ;;  %v599_v43 = vadd.f32 %v218_v39, %v212_v18  ;;  %v601_v44 = vadd.f32 %v219_v1, %v213_v23 }
  0x9a   :  { %v108_v51 = vadd.f32 %v470_v20, %v102_v11  ;;  %v109_v52 = vadd.f32 %v470_v20, %v103_v40  ;;  %v148_v53 = vadd.f32 %v487_v26, %v142_v12  ;;  %v149_v54 = vadd.f32 %v487_v26, %v143_v0 }
  0x9b   :  { %v188_v24 = vadd.f32 %v493_v28, %v182_v41  ;;  %v189_v6 = vadd.f32 %v493_v28, %v183_v42  ;;  %v96_v7 = vmul.f32 %v467_v19, %v78_v17  ;;  %v97_v8 = vmul.f32 %v467_v19, %v79_v33 }
  0x9c   :  { %v112_v9 = vmax.f32 %v108_v51, 0.0  ;;  %v113_v10 = vmax.f32 %v109_v52, 0.0  ;;  %v152_v15 = vmax.f32 %v148_v53, 0.0  ;;  %v153_v18 = vmax.f32 %v149_v54, 0.0 }
  0x9d   :  { %v192_v23 = vmax.f32 %v188_v24, 0.0  ;;  %v193_v29 = vmax.f32 %v189_v6, 0.0  ;;  %v100_v30 = vadd.f32 %v96_v7, %v90_v57  ;;  %v101_v31 = vadd.f32 %v97_v8, %v91_v58 }
  0x9e   :  { %v122_v32 = vmul.f32 %v474_v21, %v112_v9  ;;  %v123_v13 = vmul.f32 %v478_v22, %v113_v10  ;;  %v136_v14 = vmul.f32 %v484_v25, %v78_v17  ;;  %v137_v16 = vmul.f32 %v484_v25, %v79_v33 }
  0x9f   :  { %v106_v34 = vadd.f32 %v470_v20, %v100_v30  ;;  %v107_v19 = vadd.f32 %v470_v20, %v101_v31  ;;  %v176_v5 = vmul.f32 %v490_v27, %v78_v17  ;;  %v177_v37 = vmul.f32 %v490_v27, %v79_v33 }
  0xa0   :  { %v140_v3 = vadd.f32 %v136_v14, %v559_v59  ;;  %v141_v57 = vadd.f32 %v137_v16, %v561_v60  ;;  %v216_v58 = vmul.f32 %v502_v35, %v78_v17  ;;  %v217_v38 = vmul.f32 %v502_v35, %v79_v33 }
  0xa1   :  { %v110_v2 = vmax.f32 %v106_v34, 0.0  ;;  %v111_v39 = vmax.f32 %v107_v19, 0.0  ;;  %v180_v25 = vadd.f32 %v176_v5, %v563_v61  ;;  %v181_v1 = vadd.f32 %v177_v37, %v565_v62 }
  0xa2   :  { %v146_v20 = vadd.f32 %v487_v26, %v140_v3  ;;  %v147_v11 = vadd.f32 %v487_v26, %v141_v57  ;;  %v220_v27 = vadd.f32 %v216_v58, %v567_v63  ;;  %v221_v59 = vadd.f32 %v217_v38, %v569_v4 }
  0xa3   :  { %v120_v60 = vmul.f32 %v474_v21, %v110_v2  ;;  %v121_v17 = vmul.f32 %v478_v22, %v111_v39  ;;  %v186_v35 = vadd.f32 %v493_v28, %v180_v25  ;;  %v187_v33 = vadd.f32 %v493_v28, %v181_v1 }
  0xa4   :  { %v150_v40 = vmax.f32 %v146_v20, 0.0  ;;  %v151_v61 = vmax.f32 %v147_v11, 0.0  ;;  %v126_v62 = vadd.f32 %v122_v32, %v506_v36  ;;  %v127_v12 = vadd.f32 %v123_v13, %v524_v45 }
  0xa5   :  { %v190_v0 = vmax.f32 %v186_v35, 0.0  ;;  %v191_v26 = vmax.f32 %v187_v33, 0.0  ;;  %v124_v63 = vadd.f32 %v120_v60, %v506_v36  ;;  %v125_v4 = vadd.f32 %v121_v17, %v524_v45 }
  0xa6   :  { %v160_v21 = vmul.f32 %v528_v46, %v150_v40  ;;  %v161_v22 = vmul.f32 %v532_v47, %v151_v61  ;;  %v162_v41 = vmul.f32 %v528_v46, %v152_v15  ;;  %v163_v28 = vmul.f32 %v532_v47, %v153_v18 }
  0xa7   :  { %v200_v42 = vmul.f32 %v536_v48, %v190_v0  ;;  %v201_v51 = vmul.f32 %v540_v49, %v191_v26  ;;  %v202_v52 = vmul.f32 %v536_v48, %v192_v23  ;;  %v203_v53 = vmul.f32 %v540_v49, %v193_v29 }
  0xa8   :  { %v164_v54 = vadd.f32 %v160_v21, %v124_v63  ;;  %v165_v36 = vadd.f32 %v161_v22, %v125_v4  ;;  %v166_v24 = vadd.f32 %v162_v41, %v126_v62  ;;  %v167_v45 = vadd.f32 %v163_v28, %v127_v12 }
  0xa9   :  { %v226_v6 = vadd.f32 %v543_v50, %v220_v27  ;;  %v227_v7 = vadd.f32 %v543_v50, %v221_v59  ;;  %v228_v46 = vadd.f32 %v543_v50, %v599_v43  ;;  %v229_v47 = vadd.f32 %v543_v50, %v601_v44 }
  0xaa   :  { %v204_v8 = vadd.f32 %v200_v42, %v164_v54  ;;  %v205_v9 = vadd.f32 %v201_v51, %v165_v36  ;;  %v206_v10 = vadd.f32 %v202_v52, %v166_v24  ;;  %v207_v48 = vadd.f32 %v203_v53, %v167_v45 }
  0xab   :  { %v230_v15 = vmax.f32 %v226_v6, 0.0  ;;  %v231_v49 = vmax.f32 %v227_v7, 0.0  ;;  %v232_v18 = vmax.f32 %v228_v46, 0.0  ;;  %v233_v23 = vmax.f32 %v229_v47, 0.0 }
  0xad   :  { %v240_v29 = vmul.f32 %v553_v55, %v230_v15  ;;  %v241_v30 = vmul.f32 %v557_v56, %v231_v49  ;;  %v242_v31 = vmul.f32 %v553_v55, %v232_v18  ;;  %v243_v32 = vmul.f32 %v557_v56, %v233_v23 }
  0xaf   :  { %v244_v43 = vadd.f32 %v240_v29, %v204_v8  ;;  %v245_v50 = vadd.f32 %v241_v30, %v205_v9  ;;  %v246_v44 = vadd.f32 %v242_v31, %v206_v10  ;;  %v247_v13 = vadd.f32 %v243_v32, %v207_v48 }
  0xb1   :  { %v248_v14 = vmax.f32 %v244_v43, 0.0  ;;  %v249_v16 = vmax.f32 %v245_v50, 0.0  ;;  %v250_v34 = vmax.f32 %v246_v44, 0.0  ;;  %v251_v19 = vmax.f32 %v247_v13, 0.0 }
  0xb3   :  { %252 = vst [vmem:[#allocation7] sm:$0xff] %v248_v14  ;;  %253 = vst [vmem:[#allocation7 + $0x8] sm:$0xff] %v249_v16 }
  0xb4   :  { %254 = vst [vmem:[#allocation7 + $0x10] sm:$0xff] %v250_v34  ;;  %255 = vst [vmem:[#allocation7 + $0x18] sm:$0xff] %v251_v19 }
  0xb5   :  { %341 = shalt.err (!%p338_p9)
}
  0xb6   :  { %267 = dma.vmem_to_hbm [thread:$0]  %s262_s14, 512, %s663_s2, [#allocation4], %s358_s15, %s358_s15, %s359_s16  }
  0xb7   :  { %354 = dma.done.wait [#allocation4], 512  }
  0xb8   :  { %355 = vsyncadd [#allocation4], 4294966784 }
  0xb9   :  { %271 = vsyncpa [#allocation3], 1 }
  0xba   :  { %272 = vsyncpa [#allocation4], 1 }
  0xbb   :  { %273 = vsyncpa [#allocation5], 1 }

</bundles_post_ra>
